<compile_context>
chip_gen: v5e
topology: v5e:2x2
jax: 0.10.0
libtpu: 0.0.40
codegen_flags: <defaults>
</compile_context>

<pallas_src>
import jax
import jax.numpy as jnp
from jax.experimental import pallas as pl
from jax.experimental.pallas import tpu as pltpu


def _make_attention_kernel(heads: int, dim_head: int, dim: int, compute_dtype):
    inner = heads * dim_head
    inv_dim = 1.0 / dim

    def kernel(x_ref, gamma_ref, beta_ref, wqkv_ref, wout_ref, bout_ref, o_ref):
        # x_ref block: (1, N, D_pad); lanes >= dim are zero-padded.
        x = x_ref[0].astype(jnp.float32)                            # (N, D_pad)

        # ---- LayerNorm (eps=1e-5) over the real `dim` lanes, in f32 ----
        mean = jnp.sum(x, axis=-1, keepdims=True) * inv_dim         # pads are 0
        lane = jax.lax.broadcasted_iota(jnp.int32, x.shape, 1)
        xc = jnp.where(lane < dim, x - mean, 0.0)                   # mask pads
        var = jnp.sum(xc * xc, axis=-1, keepdims=True) * inv_dim
        xn = xc * jax.lax.rsqrt(var + 1e-5)
        xn = xn * gamma_ref[...] + beta_ref[...]                    # pads stay 0

        # ---- fused qkv projection: one lane-dense MXU push (3*inner lanes);
        #      1/sqrt(dim_head) already folded into the q columns of wqkv ----
        qkv = jnp.dot(xn.astype(compute_dtype), wqkv_ref[...],
                      preferred_element_type=jnp.float32)           # (N, 3*inner)

        # ---- per-head attention: statically unrolled (heads is small),
        #      static lane slices of qkv, softmax in f32 ----
        outs = []
        for h in range(heads):
            lo = h * dim_head
            q = qkv[:, lo:lo + dim_head]                            # (N, dh)
            k = qkv[:, inner + lo:inner + lo + dim_head]            # (N, dh)
            v = qkv[:, 2 * inner + lo:2 * inner + lo + dim_head]    # (N, dh)

            s = jax.lax.dot_general(                                # (N, N)
                q.astype(compute_dtype), k.astype(compute_dtype),
                dimension_numbers=(((1,), (1,)), ((), ())),
                preferred_element_type=jnp.float32)
            s = s - jnp.max(s, axis=-1, keepdims=True)
            e = jnp.exp(s)
            p = e / jnp.sum(e, axis=-1, keepdims=True)
            outs.append(jnp.dot(p.astype(compute_dtype),
                                v.astype(compute_dtype),
                                preferred_element_type=jnp.float32))  # (N, dh)

        merged = jnp.concatenate(outs, axis=-1).astype(compute_dtype)  # (N, inner)

        # ---- single fused output projection + bias; lane-dense 128-wide store ----
        o = jnp.dot(merged, wout_ref[...], preferred_element_type=jnp.float32)
        o_ref[0] = (o + bout_ref[...]).astype(o_ref.dtype)

    return kernel


def prepare_attention_params(gamma, beta, w_qkv, w_out, b_out, *, heads, dim_head,
                             compute_dtype=jnp.bfloat16):
    """One-time (per-model) weight prep: fold the 1/sqrt(dim_head) scale into
    the q columns of w_qkv, cast matmul weights to the MXU compute dtype, and
    zero-pad the embedding dim to a multiple of 128 lanes so every kernel
    load/store is lane-dense."""
    dim = gamma.shape[-1]
    inner = heads * dim_head
    assert w_qkv.shape == (dim, 3 * inner)
    assert w_out.shape == (inner, dim)

    d_pad = max(128, ((dim + 127) // 128) * 128)
    scale = dim_head ** (-0.5)

    w_qkv = jnp.concatenate([w_qkv[:, :inner] * scale, w_qkv[:, inner:]], axis=-1)
    wqkv_p = jnp.pad(w_qkv.astype(compute_dtype), ((0, d_pad - dim), (0, 0)))
    wout_p = jnp.pad(w_out.astype(compute_dtype), ((0, 0), (0, d_pad - dim)))
    gamma_p = jnp.pad(gamma.reshape(-1).astype(jnp.float32),
                      (0, d_pad - dim)).reshape(1, d_pad)
    beta_p = jnp.pad(beta.reshape(-1).astype(jnp.float32),
                     (0, d_pad - dim)).reshape(1, d_pad)
    bout_p = jnp.pad(b_out.reshape(-1).astype(jnp.float32),
                     (0, d_pad - dim)).reshape(1, d_pad)

    return dict(dim=dim, d_pad=d_pad, heads=heads, dim_head=dim_head,
                compute_dtype=compute_dtype, wqkv=wqkv_p, wout=wout_p,
                gamma=gamma_p, beta=beta_p, bout=bout_p)


def attention_forward(x, params):
    B, N, dim = x.shape
    assert dim == params["dim"]
    d_pad = params["d_pad"]
    heads, dim_head = params["heads"], params["dim_head"]
    inner = heads * dim_head
    cdt = params["compute_dtype"]

    x_p = jnp.pad(x, ((0, 0), (0, 0), (0, d_pad - dim))) if d_pad != dim else x

    kernel = _make_attention_kernel(heads, dim_head, dim, cdt)

    out = pl.pallas_call(
        kernel,
        out_shape=jax.ShapeDtypeStruct((B, N, d_pad), x.dtype),
        grid_spec=pltpu.PrefetchScalarGridSpec(
            num_scalar_prefetch=0,
            grid=(B,),                                          # one step per batch row
            in_specs=[
                pl.BlockSpec((1, N, d_pad), lambda b: (b, 0, 0)),       # x (padded)
                pl.BlockSpec((1, d_pad), lambda b: (0, 0)),             # gamma
                pl.BlockSpec((1, d_pad), lambda b: (0, 0)),             # beta
                pl.BlockSpec((d_pad, 3 * inner), lambda b: (0, 0)),     # w_qkv
                pl.BlockSpec((inner, d_pad), lambda b: (0, 0)),         # w_out
                pl.BlockSpec((1, d_pad), lambda b: (0, 0)),             # b_out
            ],
            out_specs=pl.BlockSpec((1, N, d_pad), lambda b: (b, 0, 0)),
        ),
        compiler_params=pltpu.CompilerParams(
            dimension_semantics=("parallel",),      # batch rows shard across TCs
        ),
    )(x_p, params["gamma"], params["beta"], params["wqkv"],
      params["wout"], params["bout"])

    return out[:, :, :dim] if d_pad != dim else out


def reference_forward(x, gamma, beta, w_qkv, w_out, b_out, *, heads, dim_head):
    """Pure-JAX f32 reference mirroring the PyTorch forward (dropout=0)."""
    mean = jnp.mean(x, axis=-1, keepdims=True)
    var = jnp.mean((x - mean) ** 2, axis=-1, keepdims=True)
    xn = (x - mean) / jnp.sqrt(var + 1e-5) * gamma + beta
    qkv = xn @ w_qkv
    inner = heads * dim_head
    q, k, v = jnp.split(qkv, 3, axis=-1)

    def to_heads(t):
        B, N, _ = t.shape
        return t.reshape(B, N, heads, dim_head).transpose(0, 2, 1, 3)

    q, k, v = map(to_heads, (q, k, v))
    dots = jnp.einsum("bhnd,bhmd->bhnm", q, k) * (dim_head ** -0.5)
    attn = jax.nn.softmax(dots, axis=-1)
    out = jnp.einsum("bhnm,bhmd->bhnd", attn, v)
    B, _, N, _ = out.shape
    out = out.transpose(0, 2, 1, 3).reshape(B, N, inner)
    return out @ w_out + b_out


if __name__ == "__main__":
    # Small shapes consistent with the module's forward.
    B, N, D = 2, 8, 32
    heads, dim_head = 4, 16
    inner = heads * dim_head

    key = jax.random.PRNGKey(0)
    kx, kqkv, kout, kb = jax.random.split(key, 4)

    x = jax.random.normal(kx, (B, N, D), dtype=jnp.float32)

    # PyTorch LayerNorm default init: gamma=1, beta=0.
    gamma = jnp.ones((D,), dtype=jnp.float32)
    beta = jnp.zeros((D,), dtype=jnp.float32)
    # Linear weights stored as (in, out) so the kernel does x @ W.
    w_qkv = 0.02 * jax.random.normal(kqkv, (D, 3 * inner), dtype=jnp.float32)
    w_out = 0.02 * jax.random.normal(kout, (inner, D), dtype=jnp.float32)
    b_out = 0.02 * jax.random.normal(kb, (D,), dtype=jnp.float32)

    # One-time weight prep (scale fold, cast, lane padding) — not per call.
    params = prepare_attention_params(gamma, beta, w_qkv, w_out, b_out,
                                      heads=heads, dim_head=dim_head)

    y = attention_forward(x, params)
    y = jax.block_until_ready(y)

    y_ref = reference_forward(x, gamma, beta, w_qkv, w_out, b_out,
                              heads=heads, dim_head=dim_head)
    assert y.shape == (B, N, D)
    # bf16 MXU operands -> relaxed tolerance vs f32 reference.
    assert jnp.allclose(y, y_ref, atol=1e-2, rtol=2e-2), (
        float(jnp.max(jnp.abs(y - y_ref))))

    print("KERNEL_OK")
</pallas_src>

<mosaic_0001>
module attributes {stable_mosaic.version = 11 : i64} {
  func.func @kernel(%arg0: i32, %arg1: memref<1x8x128xf32, #tpu.memory_space<vmem>>, %arg2: memref<1x128xf32, #tpu.memory_space<vmem>>, %arg3: memref<1x128xf32, #tpu.memory_space<vmem>>, %arg4: memref<128x192xbf16, #tpu.memory_space<vmem>>, %arg5: memref<64x128xbf16, #tpu.memory_space<vmem>>, %arg6: memref<1x128xf32, #tpu.memory_space<vmem>>, %arg7: memref<1x8x128xf32, #tpu.memory_space<vmem>>) attributes {dimension_semantics = [#tpu.dimension_semantics<parallel>], iteration_bounds = array<i64: 2>, scalar_prefetch = 0 : i64, scratch_operands = 0 : i64, tpu.core_type = #tpu.core_type<tc>, window_params = [{transform_indices = @transform_0, window_bounds = array<i64: 1, 8, 128>}, {pipeline_mode = #tpu.pipeline_mode<synchronous>, transform_indices = @transform_1, window_bounds = array<i64: 1, 128>}, {pipeline_mode = #tpu.pipeline_mode<synchronous>, transform_indices = @transform_2, window_bounds = array<i64: 1, 128>}, {pipeline_mode = #tpu.pipeline_mode<synchronous>, transform_indices = @transform_3, window_bounds = array<i64: 128, 192>}, {pipeline_mode = #tpu.pipeline_mode<synchronous>, transform_indices = @transform_4, window_bounds = array<i64: 64, 128>}, {pipeline_mode = #tpu.pipeline_mode<synchronous>, transform_indices = @transform_5, window_bounds = array<i64: 1, 128>}, {transform_indices = @transform_6, window_bounds = array<i64: 1, 8, 128>}]} {
    %c0 = arith.constant 0 : index
    %c0_0 = arith.constant 0 : index
    %c0_1 = arith.constant 0 : index
    %0 = vector.load %arg1[%c0, %c0_0, %c0_1] : memref<1x8x128xf32, #tpu.memory_space<vmem>>, vector<1x8x128xf32>
    %1 = vector.shape_cast %0 : vector<1x8x128xf32> to vector<8x128xf32>
    %cst = arith.constant dense<0.000000e+00> : vector<8xf32>
    %2 = vector.multi_reduction <add>, %1, %cst [1] : vector<8x128xf32> to vector<8xf32>
    %3 = vector.shape_cast %2 : vector<8xf32> to vector<8x1xf32>
    %cst_2 = arith.constant 3.125000e-02 : f32
    %4 = vector.broadcast %cst_2 : f32 to vector<8x1xf32>
    %5 = arith.mulf %3, %4 : vector<8x1xf32>
    %6 = tpu.iota {dimensions = array<i32: 1>} : vector<8x128xi32>
    %c32_i32 = arith.constant 32 : i32
    %7 = vector.broadcast %c32_i32 : i32 to vector<8x128xi32>
    %8 = arith.cmpi slt, %6, %7 : vector<8x128xi32>
    %9 = vector.broadcast %5 : vector<8x1xf32> to vector<8x128xf32>
    %10 = arith.subf %1, %9 : vector<8x128xf32>
    %cst_3 = arith.constant 0.000000e+00 : f32
    %11 = vector.broadcast %cst_3 : f32 to vector<8x128xf32>
    %12 = arith.select %8, %10, %11 : vector<8x128xi1>, vector<8x128xf32>
    %13 = arith.mulf %12, %12 : vector<8x128xf32>
    %cst_4 = arith.constant dense<0.000000e+00> : vector<8xf32>
    %14 = vector.multi_reduction <add>, %13, %cst_4 [1] : vector<8x128xf32> to vector<8xf32>
    %15 = vector.shape_cast %14 : vector<8xf32> to vector<8x1xf32>
    %cst_5 = arith.constant 3.125000e-02 : f32
    %16 = vector.broadcast %cst_5 : f32 to vector<8x1xf32>
    %17 = arith.mulf %15, %16 : vector<8x1xf32>
    %cst_6 = arith.constant 9.99999974E-6 : f32
    %18 = vector.broadcast %cst_6 : f32 to vector<8x1xf32>
    %19 = arith.addf %17, %18 : vector<8x1xf32>
    %20 = math.rsqrt %19 : vector<8x1xf32>
    %21 = vector.broadcast %20 : vector<8x1xf32> to vector<8x128xf32>
    %22 = arith.mulf %12, %21 : vector<8x128xf32>
    %c0_7 = arith.constant 0 : index
    %c0_8 = arith.constant 0 : index
    %23 = vector.load %arg2[%c0_7, %c0_8] : memref<1x128xf32, #tpu.memory_space<vmem>>, vector<1x128xf32>
    %24 = vector.broadcast %23 : vector<1x128xf32> to vector<8x128xf32>
    %25 = arith.mulf %22, %24 : vector<8x128xf32>
    %c0_9 = arith.constant 0 : index
    %c0_10 = arith.constant 0 : index
    %26 = vector.load %arg3[%c0_9, %c0_10] : memref<1x128xf32, #tpu.memory_space<vmem>>, vector<1x128xf32>
    %27 = vector.broadcast %26 : vector<1x128xf32> to vector<8x128xf32>
    %28 = arith.addf %25, %27 : vector<8x128xf32>
    %29 = arith.truncf %28 : vector<8x128xf32> to vector<8x128xbf16>
    %c0_11 = arith.constant 0 : index
    %c0_12 = arith.constant 0 : index
    %30 = vector.load %arg4[%c0_11, %c0_12] : memref<128x192xbf16, #tpu.memory_space<vmem>>, vector<128x192xbf16>
    %cst_13 = arith.constant dense<0.000000e+00> : vector<8x192xf32>
    %31 = tpu.matmul %29, %30, %cst_13 {dimension_numbers = #tpu.dot_dimension_numbers<[1], [0], [0], [1], [0, 0, 1, 1], [], []>} : vector<8x128xbf16>, vector<128x192xbf16>, vector<8x192xf32> -> vector<8x192xf32>
    %32 = vector.extract_strided_slice %31 {offsets = [0, 0], sizes = [8, 16], strides = [1, 1]} : vector<8x192xf32> to vector<8x16xf32>
    %33 = vector.extract_strided_slice %31 {offsets = [0, 64], sizes = [8, 16], strides = [1, 1]} : vector<8x192xf32> to vector<8x16xf32>
    %34 = vector.extract_strided_slice %31 {offsets = [0, 128], sizes = [8, 16], strides = [1, 1]} : vector<8x192xf32> to vector<8x16xf32>
    %35 = arith.truncf %32 : vector<8x16xf32> to vector<8x16xbf16>
    %36 = arith.truncf %33 : vector<8x16xf32> to vector<8x16xbf16>
    %cst_14 = arith.constant dense<0.000000e+00> : vector<8x8xf32>
    %37 = tpu.matmul %35, %36, %cst_14 {dimension_numbers = #tpu.dot_dimension_numbers<[1], [1], [0], [0], [0, 0, 1, 0], [], []>} : vector<8x16xbf16>, vector<8x16xbf16>, vector<8x8xf32> -> vector<8x8xf32>
    %cst_15 = arith.constant dense<0xFF800000> : vector<8xf32>
    %38 = vector.multi_reduction <maximumf>, %37, %cst_15 [1] : vector<8x8xf32> to vector<8xf32>
    %39 = vector.shape_cast %38 : vector<8xf32> to vector<8x1xf32>
    %40 = vector.broadcast %39 : vector<8x1xf32> to vector<8x8xf32>
    %41 = arith.subf %37, %40 : vector<8x8xf32>
    %42 = math.exp %41 : vector<8x8xf32>
    %cst_16 = arith.constant dense<0.000000e+00> : vector<8xf32>
    %43 = vector.multi_reduction <add>, %42, %cst_16 [1] : vector<8x8xf32> to vector<8xf32>
    %44 = vector.shape_cast %43 : vector<8xf32> to vector<8x1xf32>
    %45 = vector.broadcast %44 : vector<8x1xf32> to vector<8x8xf32>
    %46 = arith.divf %42, %45 : vector<8x8xf32>
    %47 = arith.truncf %46 : vector<8x8xf32> to vector<8x8xbf16>
    %48 = arith.truncf %34 : vector<8x16xf32> to vector<8x16xbf16>
    %cst_17 = arith.constant dense<0.000000e+00> : vector<8x16xf32>
    %49 = tpu.matmul %47, %48, %cst_17 {dimension_numbers = #tpu.dot_dimension_numbers<[1], [0], [0], [1], [0, 0, 1, 1], [], []>} : vector<8x8xbf16>, vector<8x16xbf16>, vector<8x16xf32> -> vector<8x16xf32>
    %50 = vector.extract_strided_slice %31 {offsets = [0, 16], sizes = [8, 16], strides = [1, 1]} : vector<8x192xf32> to vector<8x16xf32>
    %51 = vector.extract_strided_slice %31 {offsets = [0, 80], sizes = [8, 16], strides = [1, 1]} : vector<8x192xf32> to vector<8x16xf32>
    %52 = vector.extract_strided_slice %31 {offsets = [0, 144], sizes = [8, 16], strides = [1, 1]} : vector<8x192xf32> to vector<8x16xf32>
    %53 = arith.truncf %50 : vector<8x16xf32> to vector<8x16xbf16>
    %54 = arith.truncf %51 : vector<8x16xf32> to vector<8x16xbf16>
    %cst_18 = arith.constant dense<0.000000e+00> : vector<8x8xf32>
    %55 = tpu.matmul %53, %54, %cst_18 {dimension_numbers = #tpu.dot_dimension_numbers<[1], [1], [0], [0], [0, 0, 1, 0], [], []>} : vector<8x16xbf16>, vector<8x16xbf16>, vector<8x8xf32> -> vector<8x8xf32>
    %cst_19 = arith.constant dense<0xFF800000> : vector<8xf32>
    %56 = vector.multi_reduction <maximumf>, %55, %cst_19 [1] : vector<8x8xf32> to vector<8xf32>
    %57 = vector.shape_cast %56 : vector<8xf32> to vector<8x1xf32>
    %58 = vector.broadcast %57 : vector<8x1xf32> to vector<8x8xf32>
    %59 = arith.subf %55, %58 : vector<8x8xf32>
    %60 = math.exp %59 : vector<8x8xf32>
    %cst_20 = arith.constant dense<0.000000e+00> : vector<8xf32>
    %61 = vector.multi_reduction <add>, %60, %cst_20 [1] : vector<8x8xf32> to vector<8xf32>
    %62 = vector.shape_cast %61 : vector<8xf32> to vector<8x1xf32>
    %63 = vector.broadcast %62 : vector<8x1xf32> to vector<8x8xf32>
    %64 = arith.divf %60, %63 : vector<8x8xf32>
    %65 = arith.truncf %64 : vector<8x8xf32> to vector<8x8xbf16>
    %66 = arith.truncf %52 : vector<8x16xf32> to vector<8x16xbf16>
    %cst_21 = arith.constant dense<0.000000e+00> : vector<8x16xf32>
    %67 = tpu.matmul %65, %66, %cst_21 {dimension_numbers = #tpu.dot_dimension_numbers<[1], [0], [0], [1], [0, 0, 1, 1], [], []>} : vector<8x8xbf16>, vector<8x16xbf16>, vector<8x16xf32> -> vector<8x16xf32>
    %68 = vector.extract_strided_slice %31 {offsets = [0, 32], sizes = [8, 16], strides = [1, 1]} : vector<8x192xf32> to vector<8x16xf32>
    %69 = vector.extract_strided_slice %31 {offsets = [0, 96], sizes = [8, 16], strides = [1, 1]} : vector<8x192xf32> to vector<8x16xf32>
    %70 = vector.extract_strided_slice %31 {offsets = [0, 160], sizes = [8, 16], strides = [1, 1]} : vector<8x192xf32> to vector<8x16xf32>
    %71 = arith.truncf %68 : vector<8x16xf32> to vector<8x16xbf16>
    %72 = arith.truncf %69 : vector<8x16xf32> to vector<8x16xbf16>
    %cst_22 = arith.constant dense<0.000000e+00> : vector<8x8xf32>
    %73 = tpu.matmul %71, %72, %cst_22 {dimension_numbers = #tpu.dot_dimension_numbers<[1], [1], [0], [0], [0, 0, 1, 0], [], []>} : vector<8x16xbf16>, vector<8x16xbf16>, vector<8x8xf32> -> vector<8x8xf32>
    %cst_23 = arith.constant dense<0xFF800000> : vector<8xf32>
    %74 = vector.multi_reduction <maximumf>, %73, %cst_23 [1] : vector<8x8xf32> to vector<8xf32>
    %75 = vector.shape_cast %74 : vector<8xf32> to vector<8x1xf32>
    %76 = vector.broadcast %75 : vector<8x1xf32> to vector<8x8xf32>
    %77 = arith.subf %73, %76 : vector<8x8xf32>
    %78 = math.exp %77 : vector<8x8xf32>
    %cst_24 = arith.constant dense<0.000000e+00> : vector<8xf32>
    %79 = vector.multi_reduction <add>, %78, %cst_24 [1] : vector<8x8xf32> to vector<8xf32>
    %80 = vector.shape_cast %79 : vector<8xf32> to vector<8x1xf32>
    %81 = vector.broadcast %80 : vector<8x1xf32> to vector<8x8xf32>
    %82 = arith.divf %78, %81 : vector<8x8xf32>
    %83 = arith.truncf %82 : vector<8x8xf32> to vector<8x8xbf16>
    %84 = arith.truncf %70 : vector<8x16xf32> to vector<8x16xbf16>
    %cst_25 = arith.constant dense<0.000000e+00> : vector<8x16xf32>
    %85 = tpu.matmul %83, %84, %cst_25 {dimension_numbers = #tpu.dot_dimension_numbers<[1], [0], [0], [1], [0, 0, 1, 1], [], []>} : vector<8x8xbf16>, vector<8x16xbf16>, vector<8x16xf32> -> vector<8x16xf32>
    %86 = vector.extract_strided_slice %31 {offsets = [0, 48], sizes = [8, 16], strides = [1, 1]} : vector<8x192xf32> to vector<8x16xf32>
    %87 = vector.extract_strided_slice %31 {offsets = [0, 112], sizes = [8, 16], strides = [1, 1]} : vector<8x192xf32> to vector<8x16xf32>
    %88 = vector.extract_strided_slice %31 {offsets = [0, 176], sizes = [8, 16], strides = [1, 1]} : vector<8x192xf32> to vector<8x16xf32>
    %89 = arith.truncf %86 : vector<8x16xf32> to vector<8x16xbf16>
    %90 = arith.truncf %87 : vector<8x16xf32> to vector<8x16xbf16>
    %cst_26 = arith.constant dense<0.000000e+00> : vector<8x8xf32>
    %91 = tpu.matmul %89, %90, %cst_26 {dimension_numbers = #tpu.dot_dimension_numbers<[1], [1], [0], [0], [0, 0, 1, 0], [], []>} : vector<8x16xbf16>, vector<8x16xbf16>, vector<8x8xf32> -> vector<8x8xf32>
    %cst_27 = arith.constant dense<0xFF800000> : vector<8xf32>
    %92 = vector.multi_reduction <maximumf>, %91, %cst_27 [1] : vector<8x8xf32> to vector<8xf32>
    %93 = vector.shape_cast %92 : vector<8xf32> to vector<8x1xf32>
    %94 = vector.broadcast %93 : vector<8x1xf32> to vector<8x8xf32>
    %95 = arith.subf %91, %94 : vector<8x8xf32>
    %96 = math.exp %95 : vector<8x8xf32>
    %cst_28 = arith.constant dense<0.000000e+00> : vector<8xf32>
    %97 = vector.multi_reduction <add>, %96, %cst_28 [1] : vector<8x8xf32> to vector<8xf32>
    %98 = vector.shape_cast %97 : vector<8xf32> to vector<8x1xf32>
    %99 = vector.broadcast %98 : vector<8x1xf32> to vector<8x8xf32>
    %100 = arith.divf %96, %99 : vector<8x8xf32>
    %101 = arith.truncf %100 : vector<8x8xf32> to vector<8x8xbf16>
    %102 = arith.truncf %88 : vector<8x16xf32> to vector<8x16xbf16>
    %cst_29 = arith.constant dense<0.000000e+00> : vector<8x16xf32>
    %103 = tpu.matmul %101, %102, %cst_29 {dimension_numbers = #tpu.dot_dimension_numbers<[1], [0], [0], [1], [0, 0, 1, 1], [], []>} : vector<8x8xbf16>, vector<8x16xbf16>, vector<8x16xf32> -> vector<8x16xf32>
    %104 = tpu.concatenate %49, %67, %85, %103 in 1 : vector<8x16xf32>, vector<8x16xf32>, vector<8x16xf32>, vector<8x16xf32> -> vector<8x64xf32>
    %105 = arith.truncf %104 : vector<8x64xf32> to vector<8x64xbf16>
    %c0_30 = arith.constant 0 : index
    %c0_31 = arith.constant 0 : index
    %106 = vector.load %arg5[%c0_30, %c0_31] : memref<64x128xbf16, #tpu.memory_space<vmem>>, vector<64x128xbf16>
    %cst_32 = arith.constant dense<0.000000e+00> : vector<8x128xf32>
    %107 = tpu.matmul %105, %106, %cst_32 {dimension_numbers = #tpu.dot_dimension_numbers<[1], [0], [0], [1], [0, 0, 1, 1], [], []>} : vector<8x64xbf16>, vector<64x128xbf16>, vector<8x128xf32> -> vector<8x128xf32>
    %c0_33 = arith.constant 0 : index
    %c0_34 = arith.constant 0 : index
    %108 = vector.load %arg6[%c0_33, %c0_34] : memref<1x128xf32, #tpu.memory_space<vmem>>, vector<1x128xf32>
    %109 = vector.broadcast %108 : vector<1x128xf32> to vector<8x128xf32>
    %110 = arith.addf %107, %109 : vector<8x128xf32>
    %c0_35 = arith.constant 0 : index
    %c0_36 = arith.constant 0 : index
    %c0_37 = arith.constant 0 : index
    %111 = vector.load %arg7[%c0_35, %c0_36, %c0_37] : memref<1x8x128xf32, #tpu.memory_space<vmem>>, vector<1x8x128xf32>
    %112 = vector.shape_cast %111 : vector<1x8x128xf32> to vector<8x128xf32>
    %113 = vector.shape_cast %110 : vector<8x128xf32> to vector<1x8x128xf32>
    tpu.vector_store %arg7[%c0_35, %c0_36, %c0_37], %113 {strides = array<i32>} : memref<1x8x128xf32, #tpu.memory_space<vmem>>, vector<1x8x128xf32>,
    return
  }
  func.func @transform_0(%arg0: i32) -> (i32, i32, i32) {
    %c0_i32 = arith.constant 0 : i32
    %c0_i32_0 = arith.constant 0 : i32
    %c0_i32_1 = arith.constant 0 : i32
    return %arg0, %c0_i32, %c0_i32_0 : i32, i32, i32
  }
  func.func @transform_1(%arg0: i32) -> (i32, i32) {
    %c0_i32 = arith.constant 0 : i32
    %c0_i32_0 = arith.constant 0 : i32
    %c0_i32_1 = arith.constant 0 : i32
    return %c0_i32, %c0_i32_0 : i32, i32
  }
  func.func @transform_2(%arg0: i32) -> (i32, i32) {
    %c0_i32 = arith.constant 0 : i32
    %c0_i32_0 = arith.constant 0 : i32
    %c0_i32_1 = arith.constant 0 : i32
    return %c0_i32, %c0_i32_0 : i32, i32
  }
  func.func @transform_3(%arg0: i32) -> (i32, i32) {
    %c0_i32 = arith.constant 0 : i32
    %c0_i32_0 = arith.constant 0 : i32
    %c0_i32_1 = arith.constant 0 : i32
    return %c0_i32, %c0_i32_0 : i32, i32
  }
  func.func @transform_4(%arg0: i32) -> (i32, i32) {
    %c0_i32 = arith.constant 0 : i32
    %c0_i32_0 = arith.constant 0 : i32
    %c0_i32_1 = arith.constant 0 : i32
    return %c0_i32, %c0_i32_0 : i32, i32
  }
  func.func @transform_5(%arg0: i32) -> (i32, i32) {
    %c0_i32 = arith.constant 0 : i32
    %c0_i32_0 = arith.constant 0 : i32
    %c0_i32_1 = arith.constant 0 : i32
    return %c0_i32, %c0_i32_0 : i32, i32
  }
  func.func @transform_6(%arg0: i32) -> (i32, i32, i32) {
    %c0_i32 = arith.constant 0 : i32
    %c0_i32_0 = arith.constant 0 : i32
    %c0_i32_1 = arith.constant 0 : i32
    return %arg0, %c0_i32, %c0_i32_0 : i32, i32, i32
  }
}

</mosaic_0001>

<bundles_post_ra>
// kernel: tpu_custom_call.1
= control target key start
LH: loop header
LB: loop body
LE: loop exit
PB: predicated region body
PF: predicated region fallthrough
CT: control target
= control target key end

     0   :  { %11 = vsyncpa [#allocation3], 0  ;;  %s1381_s0 = inlined_call_operand.vmem [shape: f32[2,8,128], index: 0, kind: input, shape index: {}]   ;;  %s1382_s1 = inlined_call_operand.vmem [shape: f32[1,128], index: 1, kind: input, shape index: {}]   ;;  %s1383_s2 = inlined_call_operand.vmem [shape: f32[1,128], index: 2, kind: input, shape index: {}]   ;;  %s1384_s3 = inlined_call_operand.vmem [shape: bf16[128,192], index: 3, kind: input, shape index: {}]   ;;  %s1385_s4 = inlined_call_operand.vmem [shape: bf16[64,128], index: 4, kind: input, shape index: {}]   ;;  %s1386_s5 = inlined_call_operand.vmem [shape: f32[1,128], index: 5, kind: input, shape index: {}]   ;;  %s1387_s6 = inlined_call_operand.hbm [shape: f32[2,8,128], index: 6, kind: output, shape index: {}]  }
   0x1   :  { %13 = vsyncpa [#allocation3 + $0x1], 0  ;;  %s1124_s21 = smov 0   ;;  %s1126_s22 = smov 0  }
   0x2   :  { %s1128_s23 = smov 0   ;;  %s1130_s24 = smov 0  }
   0x3 LB: > { %s1145_s25 = sadd.s32 4294967295, %s1080_s24   ;;  %s832_s26 = sadd.s32 4294967294, %s1080_s24   ;;  %s1080_s24 = sphi %s1130_s24, %s1393_s24   ;;  %s1076_s23 = sphi %s1128_s23, %s1392_s23   ;;  %s1072_s22 = sphi %s1126_s22, %s1391_s22   ;;  %s1068_s21 = sphi %s1124_s21, %s1390_s21  }
   0x4   : > { %s1149_s27 = sadd.s32 1, %s1080_s24   ;;  %s157_s28 = sadd.s32 1, %s1076_s23 }
   0x5   : > { %s154_s29 = ssub.s32 %s1080_s24, %s1149_s27  ;;  %p167_p0 = scmp.ne.s32.totalorder %s1076_s23, %s1072_s22 }
   0x6   : > { %p155_p1 = scmp.eq.s32.totalorder %s154_s29, 0  ;;  %p168_p2 = scmp.eq.s32.totalorder %s1145_s25, 1 }
   0x7   : > { %p173_p3 = scmp.ne.s32.totalorder %s1072_s22, %s1068_s21  ;;  %p174_p4 = scmp.eq.s32.totalorder %s832_s26, 1 }
   0x8   : > { %s1160_s30 = scalar_select %p155_p1, %s1076_s23, %s157_s28  }
   0x9   : > { %p1162_p5 = por %p168_p2, %p167_p0  ;;  %p1166_p6 = por %p174_p4, %p173_p3 }
   0xa   : > { %p835_p7 = scmp.ge.s32.totalorder %s1080_s24, 1  ;;  %p214_p8 = scmp.lt.s32.totalorder %s1080_s24, 3 }
   0xc   : > { %p215_p9 = pnand %p835_p7, %p214_p8 }
   0xd   : > { %p243_p10 = scmp.lt.s32.totalorder (!%p215_p9), %s1145_s25, 1  ;;  %s1082_s28 = smov (!%p215_p9), 112  }
   0xe   : > { %218 = sbr.rel (%p215_p9) target bundleno = 1786 (0x6fa), region = 44  ;;  %s1083_s29 = smov (!%p215_p9), 64  }
   0xf   : > { %s1086_s11 = smov (!%p215_p9), 48   ;;  %s1087_s12 = smov (!%p215_p9), 32  }
  0x13   : > { %s244_s9 = scalar_select %p243_p10, %s1145_s25, 1  ;;  %v896_v1 = vld [vmem:[%s1384_s3 + $0x70] sm:$0xf]  ;;  %v946_v2 = vld [vmem:[%s1384_s3 + $0x74] sm:$0xf0]  ;;  %v252_v7 = vlaneseq  ;;  %vm460_vm4 = vcmask 1043456  }
  0x14   : > { %v945_v3 = vld [vmem:[%s1384_s3 + $0x74] sm:$0xf]  ;;  %v897_v4 = vor.u32 %v946_v2, %v896_v1  ;;  %v898_v5 = vld [vmem:[%s1384_s3 + $0x78] sm:$0xf0]  ;;  %v888_v14 = vld [vmem:[%s1384_s3 + $0x60] sm:$0xf] }
  0x15   : > { %s837_s10 = sshll.u32 %s244_s9, 3  ;;  %v901_v6 = vor.u32 %v945_v3, %v898_v5  ;;  %v253_v8 = vand.u32 127, %v252_v7  ;;  %v944_v15 = vld [vmem:[%s1384_s3 + $0x64] sm:$0xf0]  ;;  %v943_v16 = vld [vmem:[%s1384_s3 + $0x64] sm:$0xf] }
  0x16   : > { %s246_s13 = scalar_lea.vmem %s1381_s0, %s837_s10  ;;  %380 = vmatpush.bf16.msra.mxu0 %v897_v4  ;;  %v889_v17 = vor.u32 %v944_v15, %v888_v14  ;;  %v890_v18 = vld [vmem:[%s1384_s3 + $0x68] sm:$0xf0]  ;;  %v880_v20 = vld [vmem:[%s1384_s3 + $0x50] sm:$0xf]  ;;  %v942_v21 = vld [vmem:[%s1384_s3 + $0x54] sm:$0xf0] }
  0x17   : > { %v248_v0 = vld [vmem:[%s246_s13] sm:$0xff]  ;;  %393 = vmatpush.bf16.msra.mxu1 %v901_v6  ;;  %vm254_vm0 = vcmp.lt.s32.totalorder %v253_v8, 32  ;;  %v893_v19 = vor.u32 %v943_v16, %v890_v18  ;;  %v941_v22 = vld [vmem:[%s1384_s3 + $0x54] sm:$0xf]  ;;  %v881_v23 = vor.u32 %v942_v21, %v880_v20  ;;  %v882_v24 = vld [vmem:[%s1384_s3 + $0x58] sm:$0xf0] }
  0x18   : > { %249 = vadd.xlane.f32.xlu0 %v248_v0  ;;  %v885_v25 = vor.u32 %v941_v22, %v882_v24  ;;  %v872_v26 = vld [vmem:[%s1384_s3 + $0x40] sm:$0xf]  ;;  %v940_v27 = vld [vmem:[%s1384_s3 + $0x44] sm:$0xf0]  ;;  %v939_v28 = vld [vmem:[%s1384_s3 + $0x44] sm:$0xf] }
  0x19   : > { %v873_v29 = vor.u32 %v940_v27, %v872_v26  ;;  %v874_v30 = vld [vmem:[%s1384_s3 + $0x48] sm:$0xf0]  ;;  %v864_v32 = vld [vmem:[%s1384_s3 + $0x30] sm:$0xf]  ;;  %v938_v33 = vld [vmem:[%s1384_s3 + $0x34] sm:$0xf0] }
  0x1a   : > { %381 = vmatpush.bf16.msra.mxu0 %v889_v17  ;;  %v877_v31 = vor.u32 %v939_v28, %v874_v30  ;;  %v937_v34 = vld [vmem:[%s1384_s3 + $0x34] sm:$0xf]  ;;  %v865_v35 = vor.u32 %v938_v33, %v864_v32  ;;  %v866_v36 = vld [vmem:[%s1384_s3 + $0x38] sm:$0xf0]  ;;  %v856_v38 = vld [vmem:[%s1384_s3 + $0x20] sm:$0xf] }
  0x1b   : > { %394 = vmatpush.bf16.msra.mxu1 %v893_v19  ;;  %v869_v37 = vor.u32 %v937_v34, %v866_v36  ;;  %v936_v39 = vld [vmem:[%s1384_s3 + $0x24] sm:$0xf0]  ;;  %v935_v40 = vld [vmem:[%s1384_s3 + $0x24] sm:$0xf]  ;;  %v858_v42 = vld [vmem:[%s1384_s3 + $0x28] sm:$0xf0] }
  0x1c   : > { %v857_v41 = vor.u32 %v936_v39, %v856_v38  ;;  %v861_v43 = vor.u32 %v935_v40, %v858_v42  ;;  %v848_v44 = vld [vmem:[%s1384_s3 + $0x10] sm:$0xf]  ;;  %v934_v45 = vld [vmem:[%s1384_s3 + $0x14] sm:$0xf0]  ;;  %v933_v46 = vld [vmem:[%s1384_s3 + $0x14] sm:$0xf] }
  0x1d   : > { %v849_v47 = vor.u32 %v934_v45, %v848_v44  ;;  %v850_v48 = vld [vmem:[%s1384_s3 + $0x18] sm:$0xf0]  ;;  %v840_v49 = vld [vmem:[%s1384_s3] sm:$0xf]  ;;  %v932_v50 = vld [vmem:[%s1384_s3 + $0x4] sm:$0xf0] }
  0x1e   : > { %382 = vmatpush.bf16.msra.mxu0 %v881_v23  ;;  %v853_v51 = vor.u32 %v933_v46, %v850_v48  ;;  %v931_v52 = vld [vmem:[%s1384_s3 + $0x4] sm:$0xf]  ;;  %v842_v53 = vld [vmem:[%s1384_s3 + $0x8] sm:$0xf0]  ;;  %v841_v54 = vor.u32 %v932_v50, %v840_v49  ;;  %v997_v1 = vld [vmem:[%s1382_s1] ss:$0 sm:$0xff] }
  0x1f   : > { %395 = vmatpush.bf16.msra.mxu1 %v885_v25  ;;  %v845_v55 = vor.u32 %v931_v52, %v842_v53  ;;  %v998_v4 = vld [vmem:[%s1383_s2] ss:$0 sm:$0xff]  ;;  %s1084_s9 = smov 96   ;;  %s1085_s10 = smov 80   ;;  %vm410_vm5 = vcmask 130048   ;;  %vm430_vm6 = vcmask 64512  }
  0x20   : > { %s1088_s13 = smov 16  }
  0x22   : > { %383 = vmatpush.bf16.msra.mxu0 %v873_v29 }
  0x23   : > { %396 = vmatpush.bf16.msra.mxu1 %v877_v31 }
  0x26   : > { %384 = vmatpush.bf16.msra.mxu0 %v865_v35 }
  0x27   : > { %397 = vmatpush.bf16.msra.mxu1 %v869_v37 }
  0x2a   : > { %385 = vmatpush.bf16.msra.mxu0 %v857_v41 }
  0x2b   : > { %398 = vmatpush.bf16.msra.mxu1 %v861_v43 }
  0x2e   : > { %386 = vmatpush.bf16.msra.mxu0 %v849_v47 }
  0x2f   : > { %399 = vmatpush.bf16.msra.mxu1 %v853_v51 }
  0x32   : > { %387 = vmatpush.bf16.msra.mxu0 %v841_v54 }
  0x33   : > { %400 = vmatpush.bf16.msra.mxu1 %v845_v55 }
  0x8b   : > { %v250_v9 = vpop.xlane.xlu0 %249 }
  0x8c   : > { %v251_v10 = vmul.f32 0.03125, %v250_v9 }
  0x8e   : > { %v255_v11 = vsub.f32 %v248_v0, %v251_v10 }
  0x90   : > { %v1189_v12 = vsel %vm254_vm0, %v255_v11, 0.0 }
  0x91   : > { %v257_v13 = vmul.f32 %v1189_v12, %v1189_v12 }
  0x93   : > { %258 = vadd.xlane.f32.xlu0 %v257_v13 }
 0x106   : > { %v259_v56 = vpop.xlane.xlu0 %258 }
 0x107   : > { %v260_v57 = vmul.f32 0.03125, %v259_v56 }
 0x109   : > { %v261_v58 = vadd.f32 1e-05, %v260_v57 }
 0x10b   : > { %1000 = vrsqrt.f32 %v261_v58  ;;  %vm268_vm2 = vweird.f32 %v261_v58 }
 0x111   : > { %v1001_v59 = vpop.eup %1000 }
 0x112   : > { %v263_v60 = vmul.f32 %v1001_v59, %v261_v58  ;;  %vm269_vm1 = vweird.f32 %v1001_v59 }
 0x113   : > { %vm270_vm3 = vmor %vm268_vm2, %vm269_vm1 }
 0x114   : > { %v264_v61 = vmul.f32 %v1001_v59, %v263_v60 }
 0x116   : > { %v265_v62 = vmul.f32 0.5, %v264_v61 }
 0x118   : > { %v266_v63 = vsub.f32 1.5, %v265_v62 }
 0x11a   : > { %v267_v0 = vmul.f32 %v1001_v59, %v266_v63 }
 0x11c   : > { %v271_v2 = vsel %vm270_vm3, %v1001_v59, %v267_v0 }
 0x11d   : > { %v272_v3 = vmul.f32 %v271_v2, %v1189_v12 }
 0x11f   : > { %v277_v5 = vmul.f32 %v997_v1, %v272_v3 }
 0x121   : > { %v282_v6 = vadd.f32 %v998_v4, %v277_v5 }
 0x123   : > { %v283_v7 = vpack.c.bf16 %v282_v6, %v282_v6 }
 0x125   : > { %388 = vmatmul.bf16.vlgmr.msra.gmra.mxu0 %v283_v7  ;;  %401 = vmatmul.bf16.vlgmr.msra.gmra.mxu1 %v283_v7 }
 0x1a2   : > { %v389_v8 = vpop.f32.mrf.mxu0  ;;  %v402_v9 = vpop.f32.mrf.mxu1 }
 0x1a3   : > { %v406_v10 = vpack.c.bf16 %v389_v8, %v389_v8  ;;  %v1284_v11 = vpack.c.bf16 %v402_v9, %v402_v9 }
 0x1a5   : > { %477 = vrot.lane.b32.xlu0 %v406_v10, %s1082_s28  ;;  %408 = vrot.lane.b32.xlu1 %v406_v10, %s1083_s29  ;;  %v462_v12 = vsel %vm460_vm4, %v1284_v11, 0  ;;  %s928_s29 = sshll.u32 %s1145_s25, 3 }
 0x1a6   : > { %471 = vmatpush.bf16.msra.mxu3 %v462_v12 }
 0x1aa   : > { %v391_v13 = vpop.f32.mrf.mxu0  ;;  %v404_v14 = vpop.f32.mrf.mxu1 }
 0x1ad   : > { %547 = vrot.lane.b32.xlu0 %v406_v10, %s1084_s9 }
 0x1b5   : > { %616 = vrot.lane.b32.xlu0 %v406_v10, %s1085_s10 }
 0x217   : > { %v409_v15 = vpop.permute.xlu1 %408  ;;  %v478_v32 = vpop.permute.xlu0 %477 }
 0x218   : > { %v415_v16 = vsel %vm410_vm5, %v409_v15, 0 }
 0x219   : > { %424 = vmatpush.bf16.xpose.msra.mxu2 %v415_v16 }
 0x21f   : > { %v548_v42 = vpop.permute.xlu0 %547 }
 0x220   : > { %902 = vmatmul.msk.bf16.vlgmr.msra.gmra.mxu2 %vm410_vm5, %v406_v10 }
 0x227   : > { %v617_v46 = vpop.permute.xlu0 %616 }
 0x2a3   : > { %v426_v17 = vpop.f32.mrf.mxu2 }
 0x2a4   : > { %v431_v18 = vsel %vm430_vm6, %v426_v17, -inf }
 0x2a5   : > { %432 = vmax.xlane.f32.xlu1 %v431_v18 }
 0x2ab   : > { %v428_v19 = vpop.f32.mrf.mxu2 }
 0x318   : > { %v433_v20 = vpop.xlane.xlu1 %432 }
 0x319   : > { %v434_v21 = vsub.f32 %v426_v17, %v433_v20 }
 0x31b   : > { %v435_v22 = vmul.f32 1.442695, %v434_v21 }
 0x31d   : > { %1002 = vpow2.f32 %v435_v22 }
 0x323   : > { %v1003_v23 = vpop.eup %1002 }
 0x324   : > { %v437_v24 = vsel %vm430_vm6, %v1003_v23, 0.0 }
 0x325   : > { %438 = vadd.xlane.f32.xlu2 %v437_v24 }
 0x33d   : > { %479 = vrot.lane.b32.xlu2 %v406_v10, %s1086_s11 }
 0x345   : > { %549 = vrot.lane.b32.xlu2 %v406_v10, %s1087_s12 }
 0x34d   : > { %618 = vrot.lane.b32.xlu2 %v406_v10, %s1088_s13 }
 0x398   : > { %v439_v25 = vpop.xlane.xlu2 %438 }
 0x399   : > { %1004 = vrcp.f32 %v439_v25  ;;  %v451_v31 = vand.u32 2147483648, %v439_v25  ;;  %v449_v34 = vand.u32 2147483647, %v439_v25  ;;  %vm445_vm8 = vweird.f32 %v439_v25 }
 0x39b   : > { %v452_v36 = vor.u32 1.1754944e-38, %v451_v31  ;;  %vm450_vm10 = vcmp.eq.f32.partialorder %v449_v34, 8.507059e+37 }
 0x39f   : > { %v1005_v26 = vpop.eup %1004 }
 0x3a0   : > { %v441_v27 = vmul.f32 %v1005_v26, %v439_v25  ;;  %v480_v28 = vpop.permute.xlu2 %479  ;;  %vm446_vm7 = vweird.f32 %v1005_v26 }
 0x3a1   : > { %v485_v29 = vsel %vm410_vm5, %v480_v28, 0  ;;  %vm447_vm9 = vmor %vm445_vm8, %vm446_vm7 }
 0x3a2   : > { %v442_v30 = vsub.f32 1.0, %v441_v27  ;;  %494 = vmatpush.bf16.xpose.msrb.mxu3 %v485_v29 }
 0x3a4   : > { %v443_v33 = vmul.f32 %v1005_v26, %v442_v30 }
 0x3a6   : > { %v444_v35 = vadd.f32 %v1005_v26, %v443_v33 }
 0x3a8   : > { %v550_v37 = vpop.permute.xlu2 %549  ;;  %v448_v38 = vsel %vm447_vm9, %v1005_v26, %v444_v35 }
 0x3a9   : > { %v453_v39 = vsel %vm450_vm10, %v452_v36, %v448_v38  ;;  %v555_v43 = vsel %vm410_vm5, %v550_v37, 0  ;;  %vm739_vm10 = vcmask 523264  }
 0x3aa   : > { %v454_v40 = vmul.f32 %v1003_v23, %v453_v39 }
 0x3ac   : > { %v455_v41 = vpack.c.bf16 %v454_v40, %v454_v40 }
 0x3ae   : > { %903 = vmatmul.msk.bf16.vlgmr.msra.gmra.mxu3 %vm430_vm6, %v455_v41 }
 0x3af   : > { %564 = vmatpush.bf16.xpose.msra.mxu3 %v555_v43 }
 0x3b0   : > { %v619_v44 = vpop.permute.xlu2 %618 }
 0x3b1   : > { %v624_v45 = vsel %vm410_vm5, %v619_v44, 0 }
 0x3b2   : > { %633 = vmatpush.bf16.xpose.msrb.mxu0 %v624_v45 }
 0x3b9   : > { %908 = vmatmul.msk.bf16.vlgmr.msrb.gmra.mxu0 %vm410_vm5, %v617_v46 }
 0x3be   : > { %904 = vmatmul.msk.bf16.vlgmr.msrb.gmra.mxu3 %vm410_vm5, %v478_v32 }
 0x3ce   : > { %906 = vmatmul.msk.bf16.vlgmr.msra.gmra.mxu3 %vm410_vm5, %v548_v42 }
 0x431   : > { %v1305_v47 = vpop.f32.mrf.mxu3 }
 0x436   : > { %v635_v48 = vpop.f32.mrf.mxu0 }
 0x437   : > { %v639_v49 = vsel %vm430_vm6, %v635_v48, -inf }
 0x438   : > { %640 = vmax.xlane.f32.xlu0 %v639_v49 }
 0x439   : > { %v475_v50 = vpop.f32.mrf.mxu3 }
 0x43e   : > { %v637_v51 = vpop.f32.mrf.mxu0 }
 0x441   : > { %v496_v52 = vpop.f32.mrf.mxu3 }
 0x442   : > { %v500_v53 = vsel %vm430_vm6, %v496_v52, -inf }
 0x443   : > { %501 = vmax.xlane.f32.xlu2 %v500_v53 }
 0x449   : > { %v498_v54 = vpop.f32.mrf.mxu3 }
 0x44c   : > { %595 = vrot.lane.b32.xlu0 %v1284_v11, %s1084_s9 }
 0x451   : > { %v566_v55 = vpop.f32.mrf.mxu3 }
 0x452   : > { %v570_v56 = vsel %vm430_vm6, %v566_v55, -inf }
 0x453   : > { %571 = vmax.xlane.f32.xlu1 %v570_v56 }
 0x459   : > { %v568_v57 = vpop.f32.mrf.mxu3 }
 0x4ab   : > { %v641_v58 = vpop.xlane.xlu0 %640 }
 0x4ac   : > { %v642_v59 = vsub.f32 %v635_v48, %v641_v58 }
 0x4ae   : > { %v643_v60 = vmul.f32 1.442695, %v642_v59 }
 0x4b0   : > { %1006 = vpow2.f32 %v643_v60 }
 0x4b6   : > { %v1007_v61 = vpop.eup %1006  ;;  %v502_v62 = vpop.xlane.xlu2 %501 }
 0x4b7   : > { %v503_v63 = vsub.f32 %v496_v52, %v502_v62  ;;  %v645_v0 = vsel %vm430_vm6, %v1007_v61, 0.0  ;;  %v949_v62 = vld [vmem:[%s1385_s4 + $0x10] sm:$0xff] }
 0x4b8   : > { %646 = vadd.xlane.f32.xlu2 %v645_v0  ;;  %v947_v0 = vld [vmem:[%s1385_s4] sm:$0xff] }
 0x4b9   : > { %v504_v1 = vmul.f32 1.442695, %v503_v63  ;;  %v948_v63 = vld [vmem:[%s1385_s4 + $0x8] sm:$0xff] }
 0x4bb   : > { %1008 = vpow2.f32 %v504_v1 }
 0x4be   : > { %v596_v39 = vpop.permute.xlu0 %595 }
 0x4bf   : > { %v601_v44 = vsel %vm460_vm4, %v596_v39, 0 }
 0x4c1   : > { %v1009_v2 = vpop.eup %1008 }
 0x4c2   : > { %v506_v3 = vsel %vm430_vm6, %v1009_v2, 0.0 }
 0x4c3   : > { %507 = vadd.xlane.f32.xlu1 %v506_v3 }
 0x4c6   : > { %v572_v4 = vpop.xlane.xlu1 %571 }
 0x4c7   : > { %v573_v5 = vsub.f32 %v566_v55, %v572_v4 }
 0x4c9   : > { %v574_v6 = vmul.f32 1.442695, %v573_v5 }
 0x4cb   : > { %1010 = vpow2.f32 %v574_v6 }
 0x4d0   : > { %664 = vrot.lane.b32.xlu2 %v1284_v11, %s1085_s10 }
 0x4d1   : > { %v1316_v7 = vpop.eup %1010 }
 0x4d2   : > { %v576_v8 = vsel %vm430_vm6, %v1316_v7, 0.0 }
 0x4d3   : > { %577 = vadd.xlane.f32.xlu1 %v576_v8  ;;  %v999_v8 = vld [vmem:[%s1386_s5] ss:$0 sm:$0xff] }
 0x4ec   : > { %526 = vrot.lane.b32.xlu1 %v1284_v11, %s1082_s28  ;;  %s240_s28 = sand.u32 1, %s1072_s22  }
 0x4ed   : > { %s836_s9 = sshll.u32 %s240_s28, 3  ;;  %s758_s18 = scalar_lea.sflag [#allocation3], %s240_s28 }
 0x4ee   : > { %s242_s15 = scalar_lea.vmem [#allocation2], %s836_s9 }
 0x4ef   : > { %s770_s16 = sshll.u32 %s242_s15, 4  ;;  %s771_s16 = int_to_ptr.vmem [resolvable:$true] %s770_s16 }
 0x52b   : > { %v647_v9 = vpop.xlane.xlu2 %646 }
 0x52c   : > { %1012 = vrcp.f32 %v647_v9  ;;  %v659_v16 = vand.u32 2147483648, %v647_v9  ;;  %v657_v18 = vand.u32 2147483647, %v647_v9  ;;  %vm653_vm12 = vweird.f32 %v647_v9 }
 0x52e   : > { %v660_v20 = vor.u32 1.1754944e-38, %v659_v16  ;;  %vm658_vm14 = vcmp.eq.f32.partialorder %v657_v18, 8.507059e+37 }
 0x532   : > { %v1013_v10 = vpop.eup %1012 }
 0x533   : > { %v649_v12 = vmul.f32 %v1013_v10, %v647_v9  ;;  %v665_v13 = vpop.permute.xlu2 %664  ;;  %vm654_vm11 = vweird.f32 %v1013_v10 }
 0x534   : > { %v670_v14 = vsel %vm460_vm4, %v665_v13, 0  ;;  %vm655_vm13 = vmor %vm653_vm12, %vm654_vm11 }
 0x535   : > { %v650_v15 = vsub.f32 1.0, %v649_v12  ;;  %679 = vmatpush.bf16.msrb.mxu1 %v670_v14 }
 0x536   : > { %v508_v21 = vpop.xlane.xlu1 %507 }
 0x537   : > { %v651_v17 = vmul.f32 %v1013_v10, %v650_v15  ;;  %1014 = vrcp.f32 %v508_v21  ;;  %v520_v32 = vand.u32 2147483648, %v508_v21  ;;  %vm514_vm0 = vweird.f32 %v508_v21 }
 0x538   : > { %v518_v33 = vand.u32 2147483647, %v508_v21 }
 0x539   : > { %v652_v19 = vadd.f32 %v1013_v10, %v651_v17  ;;  %v521_v36 = vor.u32 1.1754944e-38, %v520_v32 }
 0x53a   : > { %vm519_vm2 = vcmp.eq.f32.partialorder %v518_v33, 8.507059e+37 }
 0x53b   : > { %v656_v11 = vsel %vm655_vm13, %v1013_v10, %v652_v19 }
 0x53c   : > { %v661_v22 = vsel %vm658_vm14, %v660_v20, %v656_v11 }
 0x53d   : > { %v662_v23 = vmul.f32 %v1007_v61, %v661_v22  ;;  %v1015_v25 = vpop.eup %1014  ;;  %v950_v61 = vld [vmem:[%s1385_s4 + $0x18] sm:$0xff] }
 0x53e   : > { %v510_v26 = vmul.f32 %v1015_v25, %v508_v21  ;;  %vm515_vm15 = vweird.f32 %v1015_v25  ;;  %747 = vmatpush.bf16.msrb.mxu3 %v950_v61 }
 0x53f   : > { %v663_v24 = vpack.c.bf16 %v662_v23, %v662_v23  ;;  %vm516_vm1 = vmor %vm514_vm0, %vm515_vm15 }
 0x540   : > { %v511_v27 = vsub.f32 1.0, %v510_v26 }
 0x541   : > { %909 = vmatmul.msk.bf16.vlgmr.msrb.gmra.mxu1 %vm430_vm6, %v663_v24 }
 0x542   : > { %v512_v29 = vmul.f32 %v1015_v25, %v511_v27  ;;  %748 = vmatpush.bf16.msrb.mxu3 %v949_v62 }
 0x544   : > { %v513_v30 = vadd.f32 %v1015_v25, %v512_v29 }
 0x546   : > { %v578_v28 = vpop.xlane.xlu1 %577  ;;  %v517_v35 = vsel %vm516_vm1, %v1015_v25, %v513_v30  ;;  %749 = vmatpush.bf16.msrb.mxu3 %v948_v63 }
 0x547   : > { %1016 = vrcp.f32 %v578_v28  ;;  %v522_v37 = vsel %vm519_vm2, %v521_v36, %v517_v35  ;;  %v590_v48 = vand.u32 2147483648, %v578_v28  ;;  %vm584_vm7 = vweird.f32 %v578_v28 }
 0x548   : > { %v523_v40 = vmul.f32 %v1009_v2, %v522_v37  ;;  %v588_v49 = vand.u32 2147483647, %v578_v28 }
 0x549   : > { %v591_v51 = vor.u32 1.1754944e-38, %v590_v48 }
 0x54a   : > { %v524_v45 = vpack.c.bf16 %v523_v40, %v523_v40  ;;  %vm589_vm9 = vcmp.eq.f32.partialorder %v588_v49, 8.507059e+37  ;;  %750 = vmatpush.bf16.msrb.mxu3 %v947_v0 }
 0x54d   : > { %v1017_v31 = vpop.eup %1016 }
 0x54e   : > { %v580_v34 = vmul.f32 %v1017_v31, %v578_v28  ;;  %vm585_vm3 = vweird.f32 %v1017_v31 }
 0x54f   : > { %vm586_vm8 = vmor %vm584_vm7, %vm585_vm3 }
 0x550   : > { %v581_v38 = vsub.f32 1.0, %v580_v34 }
 0x552   : > { %v582_v42 = vmul.f32 %v1017_v31, %v581_v38 }
 0x554   : > { %v583_v46 = vadd.f32 %v1017_v31, %v582_v42 }
 0x556   : > { %v587_v50 = vsel %vm586_vm8, %v1017_v31, %v583_v46 }
 0x557   : > { %v592_v52 = vsel %vm589_vm9, %v591_v51, %v587_v50 }
 0x558   : > { %v593_v53 = vmul.f32 %v1316_v7, %v592_v52 }
 0x55a   : > { %v594_v54 = vpack.c.bf16 %v593_v53, %v593_v53 }
 0x55e   : > { %v527_v41 = vpop.permute.xlu1 %526 }
 0x55f   : > { %v532_v43 = vsel %vm460_vm4, %v527_v41, 0  ;;  %vm698_vm4 = vcmask 261120  }
 0x560   : > { %541 = vmatpush.bf16.msrb.mxu2 %v532_v43 }
 0x563   : > { %905 = vmatmul.msk.bf16.vlgmr.msrb.gmra.mxu2 %vm430_vm6, %v524_v45 }
 0x564   : > { %610 = vmatpush.bf16.msra.mxu2 %v601_v44 }
 0x573   : > { %907 = vmatmul.msk.bf16.vlgmr.msra.gmra.mxu2 %vm430_vm6, %v594_v54  ;;  %vm700_vm6 = vcmask 392192  }
 0x5be   : > { %v681_v55 = vpop.f32.mrf.mxu1 }
 0x5bf   : > { %694 = vrot.lane.b32.xlu0 %v681_v55, %s1086_s11 }
 0x5c6   : > { %v683_v56 = vpop.f32.mrf.mxu1 }
 0x5e6   : > { %v543_v57 = vpop.f32.mrf.mxu2 }
 0x5e7   : > { %686 = vrot.lane.b32.xlu1 %v543_v57, %s1088_s13 }
 0x5ee   : > { %v545_v58 = vpop.f32.mrf.mxu2 }
 0x5f6   : > { %v612_v59 = vpop.f32.mrf.mxu2 }
 0x5f7   : > { %690 = vrot.lane.b32.xlu1 %v612_v59, %s1087_s12  ;;  %s768_s12 = scalar_lea.hbm %s1387_s6, %s928_s29  ;;  %s1038_s29 = scalar_lea.hbm %s1387_s6, 16 }
 0x5f8   : > { %s772_s17 = sshll.u32 %s768_s12, 4  ;;  %s773_s17 = int_to_ptr.hbm [resolvable:$true] %s772_s17 }
 0x5f9   : > { %s1032_s25 = sshra.s32 %s773_s17, 4  ;;  %s1033_s25 = int_to_ptr.hbm [resolvable:$true] %s1032_s25 }
 0x5fa   : > { %s1034_s19 = scalar_lea.hbm %s1033_s25, 8  ;;  %p1039_p0 = scmp.lt.s32.totalorder %s1033_s25, %s1387_s6 }
 0x5fb   : > { %p1035_p11 = scmp.ne.s32.totalorder %s1033_s25, %s1034_s19  ;;  %p1040_p1 = scmp.lt.s32.totalorder %s1038_s29, %s1034_s19 }
 0x5fd   : > { %p1036_p12 = pnand %p1035_p11, %p1162_p5  ;;  %p1041_p2 = por %p1040_p1, %p1039_p0 }
 0x5fe   : > { %v614_v60 = vpop.f32.mrf.mxu2 }
 0x5ff   : > { %p1037_p13 = pneg %p1036_p12 }
 0x601   : > { %p1042_p3 = pnand %p1041_p2, %p1037_p13 }
 0x631   : > { %v695_v4 = vpop.permute.xlu0 %694 }
 0x659   : > { %v687_v1 = vpop.permute.xlu1 %686 }
 0x65a   : > { %v697_v2 = vsel %vm410_vm5, %v1305_v47, %v687_v1 }
 0x669   : > { %v691_v3 = vpop.permute.xlu1 %690 }
 0x66a   : > { %v699_v5 = vsel %vm698_vm4, %v697_v2, %v691_v3 }
 0x66b   : > { %v701_v6 = vsel %vm700_vm6, %v699_v5, %v695_v4 }
 0x66c   : > { %v702_v7 = vpack.c.bf16 %v701_v6, %v701_v6 }
 0x66e   : > { %926 = vmatmul.msk.bf16.vlgmr.msrb.gmra.mxu3 %vm739_vm10, %v702_v7 }
 0x6f1   : > { %v752_v47 = vpop.f32.mrf.mxu3 }
 0x6f2   : > { %v753_v9 = vadd.f32 %v999_v8, %v752_v47 }
 0x6f4   : > { %756 = vst [vmem:[%s242_s15] sm:$0xff] %v753_v9 }
 0x6f5   : > { %1045 = shalt.err (!%p1042_p3)
}
 0x6f6   : > { %951 = dma.vmem_to_hbm [thread:$0]  (%p1162_p5), %s771_s16, 128, %s773_s17, %s758_s18  }
 0x6f9   : > { %v754_v10 = vpop.f32.mrf.mxu3 }
 0x6fa PF: > { %p957_p4 = scmp.ge.s32.totalorder %s1080_s24, 2  ;;  %s784_s28 = sand.u32 1, %s1068_s21  }
 0x6fb   : > { %s785_s11 = scalar_lea.sflag [#allocation3], %s784_s28 }
 0x6fc   : > { %p954_p7 = pnand %p957_p4, %p1166_p6 }
 0x6fe   : > { %p955_p8 = pneg %p954_p7 }
 0x700   : > { %1063 = dma.done.wait (%p955_p8), %s785_s11, 128  }
 0x701   : > { %1065 = vsyncadd (%p955_p8), %s785_s11, 4294967168  ;;  %p16_p9 = scmp.ge.s32.totalorder %s1149_s27, 4   ;;  %s1390_s21 = smov %s1072_s22 }
 0x702   : > { %s1391_s22 = smov %s1076_s23  ;;  %s1392_s23 = smov %s1160_s30 }
 0x703   : > { %s1393_s24 = smov %s1149_s27  ;;  %18 = sbr.rel (!%p16_p9) target bundleno = 3 (0x3), region = 79 }
 0x708   :  { %791 = vsyncpa [#allocation3], 1 }
 0x709   :  { %793 = vsyncpa [#allocation3 + $0x1], 1 }

</bundles_post_ra>
